<compile_context>
chip_gen: v7x
topology: tpu7x:2x2x1
jax: 0.10.0
libtpu: 0.0.40
codegen_flags: <defaults>
</compile_context>

<pallas_src>
import functools

import numpy as np
import jax
import jax.numpy as jnp
from jax import lax
from jax.experimental import pallas as pl
from jax.experimental.pallas import tpu as pltpu

MARGIN = 0.01   # self.margin = torch.tensor(0.01)
EPS = 1e-12     # F.normalize default eps


def _round_up(x, m):
    return ((x + m - 1) // m) * m


def _contrastive_kernel(w_ref, x_ref, out_ref, acc_ref, *,
                        lp, lpc, dk, d, nk, valid_rows, use_slabs, tail_mask):
    k = pl.program_id(0)

    x = x_ref[...].astype(jnp.float32)

    def partial_sumsq(xv):
        # Pure-VPU partial reduction: add dk/128 column slabs into a (lp, 128) partial.
        xsq = xv * xv
        if use_slabs:
            p = xsq[:, 0:128]
            for c in range(1, dk // 128):
                p = p + xsq[:, c * 128:(c + 1) * 128]
            return p                   # (lp, 128)
        return xsq                     # (lp, dk)  (single full-width block case)

    @pl.when(k == 0)
    def _():
        acc_ref[...] = jnp.zeros_like(acc_ref)

    if tail_mask:
        # Only the last D block has columns beyond d; keep all other steps mask-free.
        @pl.when(k < nk - 1)
        def _():
            acc_ref[...] += partial_sumsq(x)

        @pl.when(k == nk - 1)
        def _():
            col = lax.broadcasted_iota(jnp.int32, (lp, dk), 1)
            acc_ref[...] += partial_sumsq(
                jnp.where(col < (d - (nk - 1) * dk), x, 0.0))
    else:
        acc_ref[...] += partial_sumsq(x)

    @pl.when(k == nk - 1)
    def _finalize():
        # Single cross-lane reduce of the lane-dense accumulator.
        sumsq = jnp.sum(acc_ref[...], axis=1, keepdims=True)          # (lp, 1)
        denom = jnp.maximum(jnp.sqrt(sumsq), EPS)
        sim = sumsq / (denom * denom)    # row-wise self-similarity of normalized rows
        rows = lax.broadcasted_iota(jnp.int32, (lp, 1), 0)
        sim = jnp.where(rows < valid_rows, sim, 0.0)                  # NaN-safe pad rows

        # sim as a row vector without a transpose: diagonal select + sublane reduce.
        ri = lax.broadcasted_iota(jnp.int32, (lp, lpc), 0)
        ci = lax.broadcasted_iota(jnp.int32, (lp, lpc), 1)
        sim_row = jnp.sum(jnp.where(ri == ci, sim, 0.0),
                          axis=0, keepdims=True)                      # (1, lpc)

        # hinge[i, p] = relu(sim[i] - sim[p] + margin); W[i, p] = neg/pos pair multiplicity.
        hinge = jnp.maximum(sim - sim_row + MARGIN, 0.0)              # (lp, lpc)
        loss = jnp.sum(hinge * w_ref[...])
        out_ref[...] = jnp.zeros((8, 128), jnp.float32) + loss


def contrastive_loss_forward(sent_embeddings, splits, pos_idx):
    """JAX/Pallas equivalent of ContrastiveLoss.forward."""
    n, d = sent_embeddings.shape
    itemsize = np.dtype(sent_embeddings.dtype).itemsize
    sub = {4: 8, 2: 16, 1: 32}.get(itemsize, 8)        # sublane multiple per dtype

    l_max = max(int(l) for l in splits)
    lp = max(_round_up(l_max, sub), sub)
    lpc = max(_round_up(lp, 128), 128)                  # lane-dense finalize width
    valid_rows = min(n, lp)

    # ---- per-generation VMEM budgeting (v7x = 64 MiB physical; v5e/v6e = 128 MiB) ----
    try:
        cap = int(getattr(pltpu.get_tpu_info(), "vmem_capacity_bytes", 64 << 20))
    except Exception:
        cap = 64 << 20
    vmem_ceiling = int(0.7 * cap)
    w_bytes = 2 * lp * lpc * 4
    x_budget = max((vmem_ceiling - w_bytes - (4 << 20)) // 2,
                   2 * lp * 128 * itemsize)

    # ---- D tiling: one full-width block if it fits, else largest 128-multiple tiles ----
    d_lanes = max(_round_up(d, 128), 128)
    if 2 * lp * d_lanes * itemsize <= x_budget:
        dk, nk = d, 1
    else:
        dk_cap = (x_budget // (2 * lp * itemsize)) // 128 * 128
        dk_cap = int(min(max(dk_cap, 128), 2048))
        dk = None
        for cand in range(dk_cap, 127, -128):           # prefer dk | d -> no tail mask
            if d % cand == 0:
                dk = cand
                break
        if dk is None:
            dk = dk_cap
        nk = -(-d // dk)
    use_slabs = (dk >= 128 and dk % 128 == 0)
    tail_mask = (nk > 1 and d % dk != 0)
    acc_lanes = 128 if use_slabs else dk

    # ---- host-precomputed pair-weight matrix (splits / pos_idx are static Python) ----
    W = np.zeros((lp, lpc), dtype=np.float32)
    total = 0
    for j, l in enumerate(splits):
        l = int(l)
        pos_list = [int(p) for p in pos_idx[j]]
        neg_list = [i for i in range(l) if i not in pos_list]
        for p in pos_list:
            for i in neg_list:
                W[i, p] += 1.0
        total += len(pos_list) * len(neg_list)          # len(pos_sim) * len(neg_sim)
    w = jnp.asarray(W)

    dk_lanes = max(_round_up(dk, 128), 128)
    vmem_est = (2 * lp * dk_lanes * itemsize            # x tiles (double-buffered)
                + w_bytes                               # pair-weight matrix
                + lp * 128 * 4                          # accumulator scratch
                + 2 * 8 * 128 * 4                       # output block
                + (2 << 20))                            # slack
    vmem_limit = int(min(vmem_ceiling, max(vmem_est, 16 << 20)))

    kernel = functools.partial(
        _contrastive_kernel, lp=lp, lpc=lpc, dk=dk, d=d, nk=nk,
        valid_rows=valid_rows, use_slabs=use_slabs, tail_mask=tail_mask)

    out = pl.pallas_call(
        kernel,
        out_shape=jax.ShapeDtypeStruct((8, 128), jnp.float32),
        grid_spec=pltpu.PrefetchScalarGridSpec(
            num_scalar_prefetch=0,
            grid=(nk,),
            in_specs=[
                pl.BlockSpec((lp, lpc), lambda k: (0, 0)),   # W: fetched once (constant idx)
                pl.BlockSpec((lp, dk), lambda k: (0, k)),    # embeddings: single D sweep
            ],
            out_specs=pl.BlockSpec((8, 128), lambda k: (0, 0)),
            scratch_shapes=[pltpu.VMEM((lp, acc_lanes), jnp.float32)],
        ),
        compiler_params=pltpu.CompilerParams(
            dimension_semantics=("arbitrary",),
            vmem_limit_bytes=vmem_limit,
        ),
    )(w, sent_embeddings)

    return out[0, 0] / total


if __name__ == "__main__":
    key = jax.random.PRNGKey(0)
    n_sent, hidden = 8, 32
    sent_embeddings = jax.random.normal(key, (n_sent, hidden), dtype=jnp.float32)
    splits = [5, 3]
    pos_idx = [[0, 2], [1]]

    loss = contrastive_loss_forward(sent_embeddings, splits, pos_idx)
    loss = jax.block_until_ready(loss)

    # Pure-NumPy reference of the same (literal) semantics.
    x = np.asarray(sent_embeddings, dtype=np.float32)
    ref_loss, total = 0.0, 0
    for j, l in enumerate(splits):
        e = x[0:l]                                    # current_l never advances (literal)
        en = e / np.maximum(np.linalg.norm(e, axis=1, keepdims=True), EPS)
        sim = np.sum(en * en, axis=1)
        pos_list = list(pos_idx[j])
        neg_list = [i for i in range(l) if i not in pos_list]
        for p in pos_list:
            for q in neg_list:
                ref_loss += max(sim[q] - sim[p] + MARGIN, 0.0)
        total += len(pos_list) * len(neg_list)
    ref_loss = ref_loss / total

    assert np.allclose(float(loss), ref_loss, rtol=1e-5, atol=1e-6), (float(loss), ref_loss)
    print("KERNEL_OK")
</pallas_src>

<mosaic_0001>
module attributes {stable_mosaic.version = 11 : i64} {
  func.func @_contrastive_kernel(%arg0: i32, %arg1: memref<8x128xf32, #tpu.memory_space<vmem>>, %arg2: memref<8x32xf32, #tpu.memory_space<vmem>>, %arg3: memref<8x128xf32, #tpu.memory_space<vmem>>, %arg4: memref<8x32xf32, #tpu.memory_space<vmem>>) attributes {dimension_semantics = [#tpu.dimension_semantics<arbitrary>], iteration_bounds = array<i64: 1>, scalar_prefetch = 0 : i64, scratch_operands = 1 : i64, tpu.core_type = #tpu.core_type<tc>, window_params = [{pipeline_mode = #tpu.pipeline_mode<synchronous>, transform_indices = @transform_0, window_bounds = array<i64: 8, 128>}, {transform_indices = @transform_1, window_bounds = array<i64: 8, 32>}, {pipeline_mode = #tpu.pipeline_mode<synchronous>, transform_indices = @transform_2, window_bounds = array<i64: 8, 128>}]} {
    %c0 = arith.constant 0 : index
    %c0_0 = arith.constant 0 : index
    %0 = vector.load %arg2[%c0, %c0_0] : memref<8x32xf32, #tpu.memory_space<vmem>>, vector<8x32xf32>
    %c0_i32 = arith.constant 0 : i32
    %1 = arith.cmpi eq, %arg0, %c0_i32 : i32
    %2 = arith.extui %1 : i1 to i32
    %c0_i32_1 = arith.constant 0 : i32
    %3 = arith.cmpi ne, %2, %c0_i32_1 : i32
    scf.if %3 {
      %cst = arith.constant 0.000000e+00 : f32
      %11 = vector.broadcast %cst : f32 to vector<8x32xf32>
      %c0_8 = arith.constant 0 : index
      %c0_9 = arith.constant 0 : index
      %12 = vector.load %arg4[%c0_8, %c0_9] : memref<8x32xf32, #tpu.memory_space<vmem>>, vector<8x32xf32>
      tpu.vector_store %arg4[%c0_8, %c0_9], %11 {strides = array<i32>} : memref<8x32xf32, #tpu.memory_space<vmem>>, vector<8x32xf32>,
    } else {
    }
    %c0_2 = arith.constant 0 : index
    %c0_3 = arith.constant 0 : index
    %4 = vector.load %arg4[%c0_2, %c0_3] : memref<8x32xf32, #tpu.memory_space<vmem>>, vector<8x32xf32>
    %5 = arith.mulf %0, %0 : vector<8x32xf32>
    %6 = arith.addf %4, %5 : vector<8x32xf32>
    %c0_4 = arith.constant 0 : index
    %c0_5 = arith.constant 0 : index
    %7 = vector.load %arg4[%c0_4, %c0_5] : memref<8x32xf32, #tpu.memory_space<vmem>>, vector<8x32xf32>
    tpu.vector_store %arg4[%c0_4, %c0_5], %6 {strides = array<i32>} : memref<8x32xf32, #tpu.memory_space<vmem>>, vector<8x32xf32>,
    %c0_i32_6 = arith.constant 0 : i32
    %8 = arith.cmpi eq, %arg0, %c0_i32_6 : i32
    %9 = arith.extui %8 : i1 to i32
    %c0_i32_7 = arith.constant 0 : i32
    %10 = arith.cmpi ne, %9, %c0_i32_7 : i32
    scf.if %10 {
      %c0_8 = arith.constant 0 : index
      %c0_9 = arith.constant 0 : index
      %11 = vector.load %arg4[%c0_8, %c0_9] : memref<8x32xf32, #tpu.memory_space<vmem>>, vector<8x32xf32>
      %cst = arith.constant dense<0.000000e+00> : vector<8xf32>
      %12 = vector.multi_reduction <add>, %11, %cst [1] : vector<8x32xf32> to vector<8xf32>
      %13 = vector.shape_cast %12 : vector<8xf32> to vector<8x1xf32>
      %14 = math.sqrt %13 : vector<8x1xf32>
      %cst_10 = arith.constant 9.99999996E-13 : f32
      %15 = vector.broadcast %cst_10 : f32 to vector<8x1xf32>
      %16 = arith.maximumf %14, %15 : vector<8x1xf32>
      %17 = arith.mulf %16, %16 : vector<8x1xf32>
      %18 = arith.divf %13, %17 : vector<8x1xf32>
      %19 = tpu.iota {dimensions = array<i32: 0>} : vector<8x1xi32>
      %c8_i32 = arith.constant 8 : i32
      %20 = vector.broadcast %c8_i32 : i32 to vector<8x1xi32>
      %21 = arith.cmpi slt, %19, %20 : vector<8x1xi32>
      %cst_11 = arith.constant 0.000000e+00 : f32
      %22 = vector.broadcast %cst_11 : f32 to vector<8x1xf32>
      %23 = arith.select %21, %18, %22 : vector<8x1xi1>, vector<8x1xf32>
      %24 = tpu.iota {dimensions = array<i32: 0>} : vector<8x128xi32>
      %25 = tpu.iota {dimensions = array<i32: 1>} : vector<8x128xi32>
      %26 = arith.cmpi eq, %24, %25 : vector<8x128xi32>
      %cst_12 = arith.constant 0.000000e+00 : f32
      %27 = vector.shape_cast %23 : vector<8x1xf32> to vector<8x1xf32>
      %28 = vector.broadcast %27 : vector<8x1xf32> to vector<8x128xf32>
      %29 = vector.broadcast %cst_12 : f32 to vector<8x128xf32>
      %30 = arith.select %26, %28, %29 : vector<8x128xi1>, vector<8x128xf32>
      %cst_13 = arith.constant dense<0.000000e+00> : vector<128xf32>
      %31 = vector.multi_reduction <add>, %30, %cst_13 [0] : vector<8x128xf32> to vector<128xf32>
      %32 = vector.shape_cast %31 : vector<128xf32> to vector<1x128xf32>
      %33 = vector.broadcast %23 : vector<8x1xf32> to vector<8x128xf32>
      %34 = vector.broadcast %32 : vector<1x128xf32> to vector<8x128xf32>
      %35 = arith.subf %33, %34 : vector<8x128xf32>
      %cst_14 = arith.constant 0.00999999977 : f32
      %36 = vector.broadcast %cst_14 : f32 to vector<8x128xf32>
      %37 = arith.addf %35, %36 : vector<8x128xf32>
      %cst_15 = arith.constant 0.000000e+00 : f32
      %38 = vector.broadcast %cst_15 : f32 to vector<8x128xf32>
      %39 = arith.maximumf %37, %38 : vector<8x128xf32>
      %c0_16 = arith.constant 0 : index
      %c0_17 = arith.constant 0 : index
      %40 = vector.load %arg1[%c0_16, %c0_17] : memref<8x128xf32, #tpu.memory_space<vmem>>, vector<8x128xf32>
      %41 = arith.mulf %39, %40 : vector<8x128xf32>
      %42 = vector.shape_cast %41 : vector<8x128xf32> to vector<1x8x128xf32>
      %cst_18 = arith.constant dense<0.000000e+00> : vector<1xf32>
      %43 = vector.multi_reduction <add>, %42, %cst_18 [1, 2] : vector<1x8x128xf32> to vector<1xf32>
      %44 = vector.shape_cast %43 : vector<1xf32> to vector<1x1x1xf32>
      %45 = vector.extract %44[0, 0, 0] : f32 from vector<1x1x1xf32>
      %cst_19 = arith.constant 0.000000e+00 : f32
      %46 = vector.broadcast %cst_19 : f32 to vector<8x128xf32>
      %47 = vector.broadcast %45 : f32 to vector<8x128xf32>
      %48 = arith.addf %46, %47 : vector<8x128xf32>
      %c0_20 = arith.constant 0 : index
      %c0_21 = arith.constant 0 : index
      %49 = vector.load %arg3[%c0_20, %c0_21] : memref<8x128xf32, #tpu.memory_space<vmem>>, vector<8x128xf32>
      tpu.vector_store %arg3[%c0_20, %c0_21], %48 {strides = array<i32>} : memref<8x128xf32, #tpu.memory_space<vmem>>, vector<8x128xf32>,
    } else {
    }
    return
  }
  func.func @transform_0(%arg0: i32) -> (i32, i32) {
    %c0_i32 = arith.constant 0 : i32
    %c0_i32_0 = arith.constant 0 : i32
    %c0_i32_1 = arith.constant 0 : i32
    return %c0_i32, %c0_i32_0 : i32, i32
  }
  func.func @transform_1(%arg0: i32) -> (i32, i32) {
    %c0_i32 = arith.constant 0 : i32
    %c0_i32_0 = arith.constant 0 : i32
    return %c0_i32, %arg0 : i32, i32
  }
  func.func @transform_2(%arg0: i32) -> (i32, i32) {
    %c0_i32 = arith.constant 0 : i32
    %c0_i32_0 = arith.constant 0 : i32
    %c0_i32_1 = arith.constant 0 : i32
    return %c0_i32, %c0_i32_0 : i32, i32
  }
}

</mosaic_0001>

<bundles_post_ra>
// kernel: tpu_custom_call.1
= control target key start
LH: loop header
LB: loop body
LE: loop exit
PB: predicated region body
PF: predicated region fallthrough
CT: control target
= control target key end

     0   :  { %7 = vsyncpa [#allocation4], 0  ;;  %s250_s0 = inlined_call_operand.hbm [shape: f32[8,128], index: 0, kind: input, shape index: {}]   ;;  %s251_s1 = inlined_call_operand.hbm [shape: f32[8,32], index: 1, kind: input, shape index: {}]   ;;  %s252_s2 = inlined_call_operand.hbm [shape: f32[8,128], index: 2, kind: output, shape index: {}]  }
   0x1   :  { %8 = vsyncpa [#allocation7], 0 }
   0x2   :  { %9 = vsyncpa [#allocation5], 0  ;;  %s195_s9 = smov [#allocation3]   ;;  %s196_s11 = smov [#allocation6]  }
   0x3   :  { %s16_s10 = sshll.u32 %s195_s9, 4  ;;  %s26_s12 = sshll.u32 %s196_s11, 4  ;;  %s17_s10 = int_to_ptr.vmem [resolvable:$true] %s16_s10  ;;  %s27_s12 = int_to_ptr.vmem [resolvable:$true] %s26_s12 }
   0x4   :  { %s123_s15 = scalar_lea.hbm %s250_s0, 128 }
   0x5   :  { %p124_p0 = scmp.ne.s32.totalorder %s250_s0, %s123_s15  ;;  %p127_p1 = scmp.lt.u32.totalorder %s123_s15, %s250_s0 }
   0x7   :  { %p129_p2 = pnand %p127_p1, %p124_p0 }
   0x9   :  { %132 = shalt.err (!%p129_p2)
}
   0xa   :  { %s133_s20 = scalar_lea.vmem %s17_s10, 128  ;;  %p138_p4 = scmp.lt.s32.totalorder %s17_s10, %s17_s10 }
   0xb   :  { %p134_p3 = scmp.ne.s32.totalorder %s17_s10, %s133_s20  ;;  %p139_p5 = scmp.lt.s32.totalorder %s133_s20, %s133_s20 }
   0xd   :  { %p140_p6 = por %p139_p5, %p138_p4 }
   0xf   :  { %p141_p7 = pnand %p140_p6, %p134_p3 }
  0x11   :  { %144 = shalt.err (!%p141_p7)
}
  0x12   :  { %19 = dma.hbm_to_vmem [thread:$0]  %s250_s0, 128, %s17_s10, [#allocation4]  }
  0x13   :  { %s145_s25 = scalar_lea.hbm %s251_s1, 128 }
  0x14   :  { %p146_p8 = scmp.ne.s32.totalorder %s251_s1, %s145_s25  ;;  %p149_p9 = scmp.lt.u32.totalorder %s145_s25, %s251_s1 }
  0x16   :  { %p151_p10 = pnand %p149_p9, %p146_p8 }
  0x18   :  { %154 = shalt.err (!%p151_p10)
}
  0x19   :  { %s155_s30 = scalar_lea.vmem %s27_s12, 128  ;;  %p160_p12 = scmp.lt.s32.totalorder %s27_s12, %s27_s12 }
  0x1a   :  { %p156_p11 = scmp.ne.s32.totalorder %s27_s12, %s155_s30  ;;  %p161_p13 = scmp.lt.s32.totalorder %s155_s30, %s155_s30 }
  0x1c   :  { %p162_p0 = por %p161_p13, %p160_p12 }
  0x1e   :  { %p163_p1 = pnand %p162_p0, %p156_p11 }
  0x20   :  { %166 = shalt.err (!%p163_p1)
}
  0x21   :  { %29 = dma.hbm_to_vmem [thread:$0]  %s251_s1, 128, %s27_s12, [#allocation7]  }
  0x22   :  { %189 = dma.done.wait [#allocation4], 128  }
  0x23   :  { %190 = vsyncadd [#allocation4], 4294967168 }
  0x24   :  { %191 = dma.done.wait [#allocation7], 128  }
  0x25   :  { %192 = vsyncadd [#allocation7], 4294967168  ;;  %vm41_vm0 = vcmask 261120   ;;  %v197_v0 = vmov 0.0   ;;  %v36_v1 = vld [vmem:[#allocation6] sm:$0xff]  ;;  %v66_v15 = vlaneseq  ;;  %v83_v29 = vld [vmem:[#allocation3] sm:$0xff] }
  0x26   :  { %42 = vst.msk [vmem:[#allocation2] sm:$0xff] %vm41_vm0, %v197_v0  ;;  %v44_v3 = vmul.f32 %v36_v1, %v36_v1  ;;  %s198_s1 = smov [#allocation8]  }
  0x27   :  { %v67_v16 = vshrl.u32 %v66_v15, 7  ;;  %v71_v17 = vand.u32 127, %v66_v15  ;;  %s103_s4 = sshll.u32 %s198_s1, 4  ;;  %s104_s4 = int_to_ptr.vmem [resolvable:$true] %s103_s4 }
  0x28   :  { %s167_s6 = scalar_lea.vmem %s104_s4, 128  ;;  %p172_p3 = scmp.lt.s32.totalorder %s104_s4, %s104_s4 }
  0x29   :  { %vm72_vm3 = vcmp.eq.s32.totalorder %v67_v16, %v71_v17  ;;  %p168_p2 = scmp.ne.s32.totalorder %s104_s4, %s167_s6  ;;  %p173_p4 = scmp.lt.s32.totalorder %s167_s6, %s167_s6 }
  0x2b   :  { %p174_p5 = por %p173_p4, %p172_p3 }
  0x2d   :  { %v43_v2 = vld [vmem:[#allocation2] sm:$0xff]  ;;  %p175_p6 = pnand %p174_p5, %p168_p2 }
  0x2e   :  { %v45_v4 = vadd.f32 %v44_v3, %v43_v2 }
  0x30   :  { %47 = vst.msk [vmem:[#allocation2] sm:$0xff] %vm41_vm0, %v45_v4 }
  0x37   :  { %v51_v5 = vld [vmem:[#allocation2] sm:$0xff] }
  0x38   :  { %v52_v6 = vsel %vm41_vm0, %v51_v5, 0.0 }
  0x39   :  { %53 = vadd.xlane.f32.xlu0 %v52_v6 }
  0xc6   :  { %v54_v7 = vpop.xlane.xlu0 %53 }
  0xc7   :  { %119 = vrsqrt.f32 %v54_v7  ;;  %vm57_vm1 = vcmp.eq.f32.partialorder %v54_v7, inf  ;;  %v60_v10 = vand.u32 2147483648, %v54_v7  ;;  %vm59_vm2 = vcmp.eq.f32.partialorder %v54_v7, 0.0 }
  0xd1   :  { %v120_v8 = vpop.eup %119 }
  0xd2   :  { %v56_v9 = vmul.f32 %v120_v8, %v54_v7 }
  0xd4   :  { %v58_v11 = vsel %vm57_vm1, %v54_v7, %v56_v9 }
  0xd5   :  { %v61_v12 = vsel %vm59_vm2, %v60_v10, %v58_v11 }
  0xd6   :  { %v62_v13 = vmax.f32 %v61_v12, 1e-12 }
  0xd8   :  { %v63_v14 = vmul.f32 %v62_v13, %v62_v13 }
  0xda   :  { %121 = vrcp.f32 %v63_v14 }
  0xe4   :  { %v122_v18 = vpop.eup %121 }
  0xe5   :  { %v65_v19 = vmul.f32 %v122_v18, %v54_v7 }
  0xe7   :  { %v73_v20 = vsel %vm72_vm3, %v65_v19, 0.0 }
  0xe8   :  { %v74_v21 = vrot.slane %v73_v20, 4 }
  0xea   :  { %v75_v22 = vadd.f32 %v74_v21, %v73_v20 }
  0xec   :  { %v76_v23 = vrot.slane %v75_v22, 2 }
  0xee   :  { %v77_v24 = vadd.f32 %v76_v23, %v75_v22 }
  0xf0   :  { %v78_v25 = vrot.slane %v77_v24, 1 }
  0xf2   :  { %v79_v26 = vadd.f32 %v78_v25, %v77_v24 }
  0xf4   :  { %v80_v27 = vsub.f32 %v65_v19, %v79_v26 }
  0xf6   :  { %v81_v28 = vadd.f32 0.01, %v80_v27 }
  0xf8   :  { %v82_v30 = vmax.f32 %v81_v28, 0.0 }
  0xfa   :  { %v84_v31 = vmul.f32 %v83_v29, %v82_v30 }
  0xfc   :  { %85 = vadd.xlane.f32.xlu0 %v84_v31 }
 0x189   :  { %v86_v32 = vpop.xlane.xlu0 %85 }
 0x18a   :  { %v87_v33 = vrot.slane %v86_v32, 4 }
 0x18c   :  { %v88_v34 = vadd.f32 %v87_v33, %v86_v32 }
 0x18e   :  { %v89_v35 = vrot.slane %v88_v34, 2 }
 0x190   :  { %v90_v36 = vadd.f32 %v89_v35, %v88_v34 }
 0x192   :  { %v91_v37 = vrot.slane %v90_v36, 1 }
 0x194   :  { %v92_v38 = vadd.f32 %v91_v37, %v90_v36 }
 0x196   :  { %113 = vpush %v92_v38 }
 0x1c7   :  { %s114_s5 = spop %113 }
 0x1c8   :  { %v94_v39 = vstv %s114_s5 }
 0x1c9   :  { %96 = vst [vmem:[#allocation8] sm:$0xff] %v94_v39 }
 0x1ca   :  { %178 = shalt.err (!%p175_p6)
}
 0x1cb   :  { %s179_s9 = scalar_lea.hbm %s252_s2, 128 }
 0x1cc   :  { %p180_p7 = scmp.ne.s32.totalorder %s252_s2, %s179_s9  ;;  %p183_p8 = scmp.lt.u32.totalorder %s179_s9, %s252_s2 }
 0x1ce   :  { %p185_p9 = pnand %p183_p8, %p180_p7 }
 0x1d0   :  { %188 = shalt.err (!%p185_p9)
}
 0x1d1   :  { %106 = dma.vmem_to_hbm [thread:$0]  %s104_s4, 128, %s252_s2, [#allocation5]  }
 0x1d2   :  { %193 = dma.done.wait [#allocation5], 128  }
 0x1d3   :  { %194 = vsyncadd [#allocation5], 4294967168 }
 0x1d4   :  { %110 = vsyncpa [#allocation4], 1 }
 0x1d5   :  { %111 = vsyncpa [#allocation7], 1 }
 0x1d6   :  { %112 = vsyncpa [#allocation5], 1 }

</bundles_post_ra>
